<compile_context>
chip_gen: v7x
topology: tpu7x:2x2x1
jax: 0.10.0
libtpu: 0.0.40
codegen_flags: <defaults>
</compile_context>

<pallas_src>
import math

import jax
import jax.numpy as jnp
from jax.experimental import pallas as pl
from jax.experimental.pallas import tpu as pltpu

LN_EPS = 1e-5


def _patch_merge_kernel(x_ref, we_ref, wo_ref, b_ref, o_ref):
    """Fused LayerNorm(4C) + Linear(4C -> 2C) over one block of merged tokens.

    x_ref:  (tile_bi, 2, Wh, 2C)  [row-pair block, row parity, column, 2C]
            lanes [0:C] = even-column channels, [C:2C] = odd-column channels
    we_ref: (2C, 2C)  gamma-folded weight rows for the even-row half [q0 | q2]
    wo_ref: (2C, 2C)  gamma-folded weight rows for the odd-row  half [q1 | q3]
    b_ref:  (1, 2C)   beta @ W.T  (f32)
    o_ref:  (tile_bi * Wh, 2C)
    """
    tb, _, wh, c2 = x_ref.shape
    n = tb * wh

    x_blk = x_ref[...]
    # TODO(synk): for Wh % 8 != 0 (real Swin Wh = 28/14/7) merging (tb, Wh) may
    # emit a sublane relayout; verify with pl.lower_as_mlir on those shapes.
    xe = x_blk[:, 0, :, :].reshape(n, c2)    # even image rows -> [q0 | q2]
    xo = x_blk[:, 1, :, :].reshape(n, c2)    # odd  image rows -> [q1 | q3]

    # LayerNorm statistics over the full 4C merged feature, f32 accumulation,
    # biased variance, eps inside rsqrt (PyTorch semantics).
    inv_4c = 1.0 / float(2 * c2)
    mean = (jnp.sum(xe, axis=-1, keepdims=True, dtype=jnp.float32)
            + jnp.sum(xo, axis=-1, keepdims=True, dtype=jnp.float32)) * inv_4c

    ce = xe.astype(jnp.float32) - mean
    co = xo.astype(jnp.float32) - mean
    var = (jnp.sum(ce * ce, axis=-1, keepdims=True)
           + jnp.sum(co * co, axis=-1, keepdims=True)) * inv_4c
    inv_std = jax.lax.rsqrt(var + LN_EPS)

    mm_dtype = we_ref.dtype                  # bf16 MXU path when input is bf16
    acc = jnp.dot((ce * inv_std).astype(mm_dtype), we_ref[...],
                  preferred_element_type=jnp.float32)
    acc = acc + jnp.dot((co * inv_std).astype(mm_dtype), wo_ref[...],
                        preferred_element_type=jnp.float32)
    acc = acc + b_ref[...]                   # (1, 2C) f32 broadcast bias
    o_ref[...] = acc.astype(o_ref.dtype)


def _vmem_budget_bytes():
    """Per-TensorCore VMEM budget, leaving headroom for Mosaic scratch."""
    phys = None
    try:
        phys = getattr(pltpu.get_tpu_info(), "vmem_capacity_bytes", None)
    except Exception:
        phys = None
    if not phys:
        phys = 64 * 1024 * 1024              # conservative: v7x per-core size
    # ~48 MiB on v7x (64 MiB physical), ~96 MiB on v5e/v6e (128 MiB physical)
    return int(min(phys * 3 // 4, 100 * 1024 * 1024))


def _num_tensorcores():
    """Best-effort TensorCores-per-chip (v5e/v6e: 1, v7x: 2)."""
    try:
        dev = jax.devices()[0]
        n = getattr(dev, "num_cores", None)
        if isinstance(n, int) and n > 0:
            return n
        if "v7" in str(getattr(dev, "device_kind", "")).lower():
            return 2
    except Exception:
        pass
    return 1


def patch_merging_forward(x, patch_shape, gamma, beta, w_reduc):
    """Forward pass of PatchMerging.

    Args:
      x:           (B, H*W, C)
      patch_shape: (H, W)
      gamma, beta: (4C,) LayerNorm affine params
      w_reduc:     (2C, 4C) linear weight (PyTorch convention, y = x @ W.T)

    Returns:
      (B, H/2 * W/2, 2C), same dtype as x.
    """
    H, W = patch_shape
    B, L, C = x.shape
    assert L == H * W and H % 2 == 0 and W % 2 == 0
    Hh, Wh = H // 2, W // 2
    C2 = 2 * C

    # ---- tiny host-side parameter prep (exact f32 elementwise) ----
    wt = jnp.transpose(w_reduc).astype(jnp.float32)                   # (4C, 2C)
    bias = jnp.sum(beta.astype(jnp.float32)[:, None] * wt, axis=0)    # (2C,)
    w_fold = wt * gamma.astype(jnp.float32)[:, None]                  # diag(gamma) @ W.T
    # Merged feature order is [q0 | q1 | q2 | q3]; even rows carry [q0 | q2],
    # odd rows carry [q1 | q3] -> permute weight rows accordingly.
    w_even = jnp.concatenate([w_fold[0:C], w_fold[2 * C:3 * C]], axis=0)   # (2C, 2C)
    w_odd = jnp.concatenate([w_fold[C:2 * C], w_fold[3 * C:4 * C]], axis=0)

    mm_dtype = jnp.bfloat16 if x.dtype == jnp.bfloat16 else jnp.float32
    w_even = w_even.astype(mm_dtype)
    w_odd = w_odd.astype(mm_dtype)
    bias2 = bias.reshape(1, C2)

    # ---- free contiguous view: each grid block is one contiguous HBM chunk ----
    x5 = x.reshape(B * Hh, 2, Wh, C2)
    n_rows = B * Hh

    # ---- tile size from the VMEM budget (mem-bound kernel: bigger is better) ----
    in_bytes = jnp.dtype(x.dtype).itemsize
    mm_bytes = jnp.dtype(mm_dtype).itemsize
    per_token = (2 * 4 * C * in_bytes       # double-buffered input block
                 + 2 * 2 * C * in_bytes     # double-buffered output block
                 + 2 * 4 * C * 4            # centered halves (f32)
                 + 4 * C * mm_bytes         # normalized halves (matmul dtype)
                 + 2 * C * 4)               # f32 accumulator
    budget = _vmem_budget_bytes()
    tokens = max(int((budget - 4 * 1024 * 1024) / (per_token * 1.25)), 8)

    m = 8 // math.gcd(Wh, 8)                # granularity so tile_bi*Wh % 8 == 0

    def _round_tile_bi(t):
        t = int(max(t, 1))
        if t >= n_rows:
            return n_rows
        return min(max((t // m) * m, min(m, n_rows)), n_rows)

    tile_bi = _round_tile_bi(tokens // max(Wh, 1))
    if _num_tensorcores() > 1 and n_rows > m:
        # keep >=2 grid steps only when 2 TensorCores can actually share them
        tile_bi = min(tile_bi, _round_tile_bi(pl.cdiv(n_rows, 2)))

    grid = (pl.cdiv(n_rows, tile_bi),)      # ragged last tile: OOB rows discarded

    out = pl.pallas_call(
        _patch_merge_kernel,
        out_shape=jax.ShapeDtypeStruct((n_rows * Wh, C2), x.dtype),
        grid_spec=pltpu.PrefetchScalarGridSpec(
            num_scalar_prefetch=0,
            grid=grid,
            in_specs=[
                pl.BlockSpec((tile_bi, 2, Wh, C2), lambda i: (i, 0, 0, 0)),
                pl.BlockSpec((C2, C2), lambda i: (0, 0)),   # resident weight (even)
                pl.BlockSpec((C2, C2), lambda i: (0, 0)),   # resident weight (odd)
                pl.BlockSpec((1, C2), lambda i: (0, 0)),    # resident bias
            ],
            out_specs=pl.BlockSpec((tile_bi * Wh, C2), lambda i: (i, 0)),
        ),
        compiler_params=pltpu.CompilerParams(
            dimension_semantics=("parallel",),
            vmem_limit_bytes=budget,
        ),
    )(x5, w_even, w_odd, bias2)

    # contiguous (free) reshape back to (B, H/2*W/2, 2C); no lane slicing needed
    return out.reshape(B, Hh * Wh, C2)


def _reference_forward(x, patch_shape, gamma, beta, w_reduc):
    """Pure-JAX reference mirroring the PyTorch module (f32)."""
    H, W = patch_shape
    B, _, C = x.shape
    xhw = x.astype(jnp.float32).reshape(B, H, W, C)
    x0 = xhw[:, 0::2, 0::2, :]
    x1 = xhw[:, 1::2, 0::2, :]
    x2 = xhw[:, 0::2, 1::2, :]
    x3 = xhw[:, 1::2, 1::2, :]
    xm = jnp.concatenate([x0, x1, x2, x3], axis=-1).reshape(B, -1, 4 * C)
    mean = jnp.mean(xm, axis=-1, keepdims=True)
    var = jnp.mean((xm - mean) ** 2, axis=-1, keepdims=True)
    xn = (xm - mean) * jax.lax.rsqrt(var + LN_EPS)
    y = xn * gamma + beta
    return jnp.einsum("blk,ok->blo", y, w_reduc.astype(jnp.float32))


if __name__ == "__main__":
    # PatchMerging(patch_shape=(16, 16), in_channels=4)
    B, H, W, C = 2, 16, 16, 4
    key = jax.random.PRNGKey(0)
    kx, kw, kg, kb = jax.random.split(key, 4)

    x = jax.random.normal(kx, (B, H * W, C), dtype=jnp.float32)
    gamma = 1.0 + 0.1 * jax.random.normal(kg, (4 * C,), dtype=jnp.float32)
    beta = 0.1 * jax.random.normal(kb, (4 * C,), dtype=jnp.float32)
    bound = 1.0 / jnp.sqrt(jnp.float32(4 * C))
    w_reduc = jax.random.uniform(
        kw, (2 * C, 4 * C), minval=-bound, maxval=bound, dtype=jnp.float32)

    # f32 path (matches the PyTorch module's default dtype)
    out = jax.block_until_ready(
        patch_merging_forward(x, (H, W), gamma, beta, w_reduc))
    ref = _reference_forward(x, (H, W), gamma, beta, w_reduc)
    assert out.shape == (B, (H // 2) * (W // 2), 2 * C), out.shape
    assert jnp.allclose(out, ref, atol=1e-3, rtol=1e-3), "f32 mismatch vs reference"

    # bf16 path (bf16 MXU matmuls, f32 LN stats) with a looser tolerance
    x_bf = x.astype(jnp.bfloat16)
    out_bf = jax.block_until_ready(
        patch_merging_forward(x_bf, (H, W), gamma, beta, w_reduc))
    ref_bf = _reference_forward(x_bf.astype(jnp.float32), (H, W), gamma, beta, w_reduc)
    assert out_bf.dtype == jnp.bfloat16
    assert jnp.allclose(out_bf.astype(jnp.float32), ref_bf, atol=5e-2, rtol=5e-2), \
        "bf16 mismatch vs reference"

    print("KERNEL_OK")
</pallas_src>

<mosaic_0001>
module attributes {stable_mosaic.version = 11 : i64} {
  func.func @_patch_merge_kernel(%arg0: i32, %arg1: memref<16x2x8x8xf32, #tpu.memory_space<vmem>>, %arg2: memref<8x8xf32, #tpu.memory_space<vmem>>, %arg3: memref<8x8xf32, #tpu.memory_space<vmem>>, %arg4: memref<1x8xf32, #tpu.memory_space<vmem>>, %arg5: memref<128x8xf32, #tpu.memory_space<vmem>>) attributes {dimension_semantics = [#tpu.dimension_semantics<parallel>], iteration_bounds = array<i64: 1>, scalar_prefetch = 0 : i64, scratch_operands = 0 : i64, tpu.core_type = #tpu.core_type<tc>, window_params = [{transform_indices = @transform_0, window_bounds = array<i64: 16, 2, 8, 8>}, {pipeline_mode = #tpu.pipeline_mode<synchronous>, transform_indices = @transform_1, window_bounds = array<i64: 8, 8>}, {pipeline_mode = #tpu.pipeline_mode<synchronous>, transform_indices = @transform_2, window_bounds = array<i64: 8, 8>}, {pipeline_mode = #tpu.pipeline_mode<synchronous>, transform_indices = @transform_3, window_bounds = array<i64: 1, 8>}, {transform_indices = @transform_4, window_bounds = array<i64: 128, 8>}]} {
    %c0 = arith.constant 0 : index
    %c0_0 = arith.constant 0 : index
    %c0_1 = arith.constant 0 : index
    %c0_2 = arith.constant 0 : index
    %0 = vector.load %arg1[%c0, %c0_0, %c0_1, %c0_2] : memref<16x2x8x8xf32, #tpu.memory_space<vmem>>, vector<16x2x8x8xf32>
    %1 = vector.extract_strided_slice %0 {offsets = [0, 0, 0, 0], sizes = [16, 1, 8, 8], strides = [1, 1, 1, 1]} : vector<16x2x8x8xf32> to vector<16x1x8x8xf32>
    %2 = vector.shape_cast %1 : vector<16x1x8x8xf32> to vector<16x8x8xf32>
    %3 = vector.shape_cast %2 : vector<16x8x8xf32> to vector<128x8xf32>
    %4 = vector.extract_strided_slice %0 {offsets = [0, 1, 0, 0], sizes = [16, 1, 8, 8], strides = [1, 1, 1, 1]} : vector<16x2x8x8xf32> to vector<16x1x8x8xf32>
    %5 = vector.shape_cast %4 : vector<16x1x8x8xf32> to vector<16x8x8xf32>
    %6 = vector.shape_cast %5 : vector<16x8x8xf32> to vector<128x8xf32>
    %cst = arith.constant dense<0.000000e+00> : vector<128xf32>
    %7 = vector.multi_reduction <add>, %3, %cst [1] : vector<128x8xf32> to vector<128xf32>
    %8 = vector.shape_cast %7 : vector<128xf32> to vector<128x1xf32>
    %cst_3 = arith.constant dense<0.000000e+00> : vector<128xf32>
    %9 = vector.multi_reduction <add>, %6, %cst_3 [1] : vector<128x8xf32> to vector<128xf32>
    %10 = vector.shape_cast %9 : vector<128xf32> to vector<128x1xf32>
    %11 = arith.addf %8, %10 : vector<128x1xf32>
    %cst_4 = arith.constant 6.250000e-02 : f32
    %12 = vector.broadcast %cst_4 : f32 to vector<128x1xf32>
    %13 = arith.mulf %11, %12 : vector<128x1xf32>
    %14 = vector.broadcast %13 : vector<128x1xf32> to vector<128x8xf32>
    %15 = arith.subf %3, %14 : vector<128x8xf32>
    %16 = vector.broadcast %13 : vector<128x1xf32> to vector<128x8xf32>
    %17 = arith.subf %6, %16 : vector<128x8xf32>
    %18 = arith.mulf %15, %15 : vector<128x8xf32>
    %cst_5 = arith.constant dense<0.000000e+00> : vector<128xf32>
    %19 = vector.multi_reduction <add>, %18, %cst_5 [1] : vector<128x8xf32> to vector<128xf32>
    %20 = vector.shape_cast %19 : vector<128xf32> to vector<128x1xf32>
    %21 = arith.mulf %17, %17 : vector<128x8xf32>
    %cst_6 = arith.constant dense<0.000000e+00> : vector<128xf32>
    %22 = vector.multi_reduction <add>, %21, %cst_6 [1] : vector<128x8xf32> to vector<128xf32>
    %23 = vector.shape_cast %22 : vector<128xf32> to vector<128x1xf32>
    %24 = arith.addf %20, %23 : vector<128x1xf32>
    %cst_7 = arith.constant 6.250000e-02 : f32
    %25 = vector.broadcast %cst_7 : f32 to vector<128x1xf32>
    %26 = arith.mulf %24, %25 : vector<128x1xf32>
    %cst_8 = arith.constant 9.99999974E-6 : f32
    %27 = vector.broadcast %cst_8 : f32 to vector<128x1xf32>
    %28 = arith.addf %26, %27 : vector<128x1xf32>
    %29 = math.rsqrt %28 : vector<128x1xf32>
    %30 = vector.broadcast %29 : vector<128x1xf32> to vector<128x8xf32>
    %31 = arith.mulf %15, %30 : vector<128x8xf32>
    %c0_9 = arith.constant 0 : index
    %c0_10 = arith.constant 0 : index
    %32 = vector.load %arg2[%c0_9, %c0_10] : memref<8x8xf32, #tpu.memory_space<vmem>>, vector<8x8xf32>
    %cst_11 = arith.constant dense<0.000000e+00> : vector<128x8xf32>
    %33 = tpu.matmul %31, %32, %cst_11 {dimension_numbers = #tpu.dot_dimension_numbers<[1], [0], [0], [1], [0, 0, 1, 1], [], []>} : vector<128x8xf32>, vector<8x8xf32>, vector<128x8xf32> -> vector<128x8xf32>
    %34 = vector.broadcast %29 : vector<128x1xf32> to vector<128x8xf32>
    %35 = arith.mulf %17, %34 : vector<128x8xf32>
    %c0_12 = arith.constant 0 : index
    %c0_13 = arith.constant 0 : index
    %36 = vector.load %arg3[%c0_12, %c0_13] : memref<8x8xf32, #tpu.memory_space<vmem>>, vector<8x8xf32>
    %cst_14 = arith.constant dense<0.000000e+00> : vector<128x8xf32>
    %37 = tpu.matmul %35, %36, %cst_14 {dimension_numbers = #tpu.dot_dimension_numbers<[1], [0], [0], [1], [0, 0, 1, 1], [], []>} : vector<128x8xf32>, vector<8x8xf32>, vector<128x8xf32> -> vector<128x8xf32>
    %38 = arith.addf %33, %37 : vector<128x8xf32>
    %c0_15 = arith.constant 0 : index
    %c0_16 = arith.constant 0 : index
    %39 = vector.load %arg4[%c0_15, %c0_16] : memref<1x8xf32, #tpu.memory_space<vmem>>, vector<1x8xf32>
    %40 = vector.broadcast %39 : vector<1x8xf32> to vector<128x8xf32>
    %41 = arith.addf %38, %40 : vector<128x8xf32>
    %c0_17 = arith.constant 0 : index
    %c0_18 = arith.constant 0 : index
    %42 = vector.load %arg5[%c0_17, %c0_18] : memref<128x8xf32, #tpu.memory_space<vmem>>, vector<128x8xf32>
    tpu.vector_store %arg5[%c0_17, %c0_18], %41 {strides = array<i32>} : memref<128x8xf32, #tpu.memory_space<vmem>>, vector<128x8xf32>,
    return
  }
  func.func @transform_0(%arg0: i32) -> (i32, i32, i32, i32) {
    %c0_i32 = arith.constant 0 : i32
    %c0_i32_0 = arith.constant 0 : i32
    %c0_i32_1 = arith.constant 0 : i32
    %c0_i32_2 = arith.constant 0 : i32
    return %arg0, %c0_i32, %c0_i32_0, %c0_i32_1 : i32, i32, i32, i32
  }
  func.func @transform_1(%arg0: i32) -> (i32, i32) {
    %c0_i32 = arith.constant 0 : i32
    %c0_i32_0 = arith.constant 0 : i32
    %c0_i32_1 = arith.constant 0 : i32
    return %c0_i32, %c0_i32_0 : i32, i32
  }
  func.func @transform_2(%arg0: i32) -> (i32, i32) {
    %c0_i32 = arith.constant 0 : i32
    %c0_i32_0 = arith.constant 0 : i32
    %c0_i32_1 = arith.constant 0 : i32
    return %c0_i32, %c0_i32_0 : i32, i32
  }
  func.func @transform_3(%arg0: i32) -> (i32, i32) {
    %c0_i32 = arith.constant 0 : i32
    %c0_i32_0 = arith.constant 0 : i32
    %c0_i32_1 = arith.constant 0 : i32
    return %c0_i32, %c0_i32_0 : i32, i32
  }
  func.func @transform_4(%arg0: i32) -> (i32, i32) {
    %c0_i32 = arith.constant 0 : i32
    %c0_i32_0 = arith.constant 0 : i32
    return %arg0, %c0_i32 : i32, i32
  }
}

</mosaic_0001>

<bundles_post_ra>
// kernel: tpu_custom_call.1
= control target key start
LH: loop header
LB: loop body
LE: loop exit
PB: predicated region body
PF: predicated region fallthrough
CT: control target
= control target key end

     0   :  { %vm49_vm0 = vcmask 64512   ;;  %s1628_s0 = inlined_call_operand.vmem [shape: f32[16,2,8,8], index: 0, kind: input, shape index: {}]   ;;  %s1629_s2 = inlined_call_operand.vmem [shape: f32[8,8], index: 2, kind: input, shape index: {}]   ;;  %s1630_s1 = inlined_call_operand.vmem [shape: f32[8,8], index: 1, kind: input, shape index: {}]   ;;  %s1631_s3 = inlined_call_operand.vmem [shape: f32[1,8], index: 3, kind: input, shape index: {}]   ;;  %s1632_s4 = inlined_call_operand.vmem [shape: f32[128,8], index: 4, kind: output, shape index: {}]  }
   0x1   :  { %v1060_v0 = vld [vmem:[%s1628_s0 + $0x10] sm:$0xff]  ;;  %v1065_v1 = vld [vmem:[%s1628_s0] sm:$0xff]  ;;  %v1070_v2 = vld [vmem:[%s1628_s0 + $0x18] sm:$0xff] }
   0x2   :  { %v53_v3 = vsel %vm49_vm0, %v1060_v0, 0.0  ;;  %v50_v4 = vsel %vm49_vm0, %v1065_v1, 0.0  ;;  %v1079_v5 = vld [vmem:[%s1628_s0 + $0x8] sm:$0xff]  ;;  %v101_v6 = vsel %vm49_vm0, %v1070_v2, 0.0  ;;  %v1093_v9 = vld [vmem:[%s1628_s0 + $0x20] sm:$0xff]  ;;  %v1102_v12 = vld [vmem:[%s1628_s0 + $0x38] sm:$0xff] }
   0x3   :  { %54 = vadd.xlane.f32.xlu1 %v53_v3  ;;  %51 = vadd.xlane.f32.xlu0 %v50_v4  ;;  %v98_v7 = vsel %vm49_vm0, %v1079_v5, 0.0  ;;  %v1088_v8 = vld [vmem:[%s1628_s0 + $0x28] sm:$0xff]  ;;  %v56_v11 = vsel %vm49_vm0, %v1093_v9, 0.0  ;;  %v1107_v13 = vld [vmem:[%s1628_s0 + $0x30] sm:$0xff]  ;;  %v107_v14 = vsel %vm49_vm0, %v1102_v12, 0.0  ;;  %v1121_v17 = vld [vmem:[%s1628_s0 + $0x40] sm:$0xff] }
   0x4   :  { %v104_v10 = vsel %vm49_vm0, %v1088_v8, 0.0  ;;  %v59_v15 = vsel %vm49_vm0, %v1107_v13, 0.0  ;;  %v1116_v16 = vld [vmem:[%s1628_s0 + $0x48] sm:$0xff]  ;;  %v62_v19 = vsel %vm49_vm0, %v1121_v17, 0.0  ;;  %v1130_v20 = vld [vmem:[%s1628_s0 + $0x58] sm:$0xff]  ;;  %v1135_v21 = vld [vmem:[%s1628_s0 + $0x50] sm:$0xff] }
   0x5   :  { %v110_v18 = vsel %vm49_vm0, %v1116_v16, 0.0  ;;  %v113_v22 = vsel %vm49_vm0, %v1130_v20, 0.0  ;;  %v65_v23 = vsel %vm49_vm0, %v1135_v21, 0.0  ;;  %v1144_v24 = vld [vmem:[%s1628_s0 + $0x68] sm:$0xff]  ;;  %v1149_v25 = vld [vmem:[%s1628_s0 + $0x60] sm:$0xff]  ;;  %v1158_v28 = vld [vmem:[%s1628_s0 + $0x78] sm:$0xff] }
   0x6   :  { %v116_v26 = vsel %vm49_vm0, %v1144_v24, 0.0  ;;  %v68_v27 = vsel %vm49_vm0, %v1149_v25, 0.0  ;;  %v1163_v29 = vld [vmem:[%s1628_s0 + $0x70] sm:$0xff]  ;;  %v119_v30 = vsel %vm49_vm0, %v1158_v28, 0.0  ;;  %v1172_v32 = vld [vmem:[%s1628_s0 + $0x88] sm:$0xff]  ;;  %v1177_v33 = vld [vmem:[%s1628_s0 + $0x80] sm:$0xff] }
   0x7   :  { %102 = vadd.xlane.f32.xlu1 %v101_v6  ;;  %99 = vadd.xlane.f32.xlu0 %v98_v7  ;;  %v71_v31 = vsel %vm49_vm0, %v1163_v29, 0.0  ;;  %v122_v34 = vsel %vm49_vm0, %v1172_v32, 0.0  ;;  %v74_v35 = vsel %vm49_vm0, %v1177_v33, 0.0  ;;  %v1186_v36 = vld [vmem:[%s1628_s0 + $0x98] sm:$0xff]  ;;  %v1191_v37 = vld [vmem:[%s1628_s0 + $0x90] sm:$0xff]  ;;  %v1200_v40 = vld [vmem:[%s1628_s0 + $0xa8] sm:$0xff] }
   0x8   :  { %v125_v38 = vsel %vm49_vm0, %v1186_v36, 0.0  ;;  %v77_v39 = vsel %vm49_vm0, %v1191_v37, 0.0  ;;  %v1205_v41 = vld [vmem:[%s1628_s0 + $0xa0] sm:$0xff]  ;;  %v128_v42 = vsel %vm49_vm0, %v1200_v40, 0.0  ;;  %v1214_v44 = vld [vmem:[%s1628_s0 + $0xb8] sm:$0xff]  ;;  %v1219_v45 = vld [vmem:[%s1628_s0 + $0xb0] sm:$0xff] }
   0x9   :  { %v80_v43 = vsel %vm49_vm0, %v1205_v41, 0.0  ;;  %v131_v46 = vsel %vm49_vm0, %v1214_v44, 0.0  ;;  %v83_v47 = vsel %vm49_vm0, %v1219_v45, 0.0  ;;  %v1228_v48 = vld [vmem:[%s1628_s0 + $0xc8] sm:$0xff]  ;;  %v1233_v49 = vld [vmem:[%s1628_s0 + $0xc0] sm:$0xff]  ;;  %v1242_v52 = vld [vmem:[%s1628_s0 + $0xd8] sm:$0xff] }
   0xa   :  { %v134_v50 = vsel %vm49_vm0, %v1228_v48, 0.0  ;;  %v86_v51 = vsel %vm49_vm0, %v1233_v49, 0.0  ;;  %v1247_v53 = vld [vmem:[%s1628_s0 + $0xd0] sm:$0xff]  ;;  %v137_v54 = vsel %vm49_vm0, %v1242_v52, 0.0  ;;  %v1256_v56 = vld [vmem:[%s1628_s0 + $0xe8] sm:$0xff]  ;;  %v1261_v57 = vld [vmem:[%s1628_s0 + $0xe0] sm:$0xff] }
   0xb   :  { %105 = vadd.xlane.f32.xlu1 %v104_v10  ;;  %57 = vadd.xlane.f32.xlu0 %v56_v11  ;;  %v89_v55 = vsel %vm49_vm0, %v1247_v53, 0.0  ;;  %v140_v58 = vsel %vm49_vm0, %v1256_v56, 0.0  ;;  %v92_v59 = vsel %vm49_vm0, %v1261_v57, 0.0  ;;  %v1270_v60 = vld [vmem:[%s1628_s0 + $0xf8] sm:$0xff]  ;;  %v1275_v61 = vld [vmem:[%s1628_s0 + $0xf0] sm:$0xff] }
   0xc   :  { %v143_v62 = vsel %vm49_vm0, %v1270_v60, 0.0  ;;  %v95_v63 = vsel %vm49_vm0, %v1275_v61, 0.0 }
   0xf   :  { %108 = vadd.xlane.f32.xlu1 %v107_v14  ;;  %60 = vadd.xlane.f32.xlu0 %v59_v15 }
  0x13   :  { %111 = vadd.xlane.f32.xlu1 %v110_v18  ;;  %63 = vadd.xlane.f32.xlu0 %v62_v19 }
  0x17   :  { %114 = vadd.xlane.f32.xlu1 %v113_v22  ;;  %66 = vadd.xlane.f32.xlu0 %v65_v23 }
  0x1b   :  { %117 = vadd.xlane.f32.xlu1 %v116_v26  ;;  %69 = vadd.xlane.f32.xlu0 %v68_v27 }
  0x1f   :  { %120 = vadd.xlane.f32.xlu1 %v119_v30  ;;  %72 = vadd.xlane.f32.xlu0 %v71_v31 }
  0x23   :  { %123 = vadd.xlane.f32.xlu1 %v122_v34  ;;  %75 = vadd.xlane.f32.xlu0 %v74_v35 }
  0x27   :  { %126 = vadd.xlane.f32.xlu1 %v125_v38  ;;  %78 = vadd.xlane.f32.xlu0 %v77_v39 }
  0x2b   :  { %129 = vadd.xlane.f32.xlu1 %v128_v42  ;;  %81 = vadd.xlane.f32.xlu0 %v80_v43 }
  0x2f   :  { %132 = vadd.xlane.f32.xlu1 %v131_v46  ;;  %84 = vadd.xlane.f32.xlu0 %v83_v47 }
  0x33   :  { %135 = vadd.xlane.f32.xlu1 %v134_v50  ;;  %87 = vadd.xlane.f32.xlu0 %v86_v51 }
  0x37   :  { %138 = vadd.xlane.f32.xlu1 %v137_v54  ;;  %90 = vadd.xlane.f32.xlu0 %v89_v55 }
  0x3b   :  { %141 = vadd.xlane.f32.xlu1 %v140_v58  ;;  %93 = vadd.xlane.f32.xlu0 %v92_v59 }
  0x3f   :  { %144 = vadd.xlane.f32.xlu1 %v143_v62  ;;  %96 = vadd.xlane.f32.xlu0 %v95_v63 }
  0x90   :  { %v55_v3 = vpop.xlane.xlu1 %54  ;;  %v52_v4 = vpop.xlane.xlu0 %51 }
  0x94   :  { %v103_v6 = vpop.xlane.xlu1 %102  ;;  %v100_v7 = vpop.xlane.xlu0 %99 }
  0x95   :  { %v147_v10 = vadd.f32 %v103_v6, %v55_v3  ;;  %v146_v11 = vadd.f32 %v100_v7, %v52_v4 }
  0x97   :  { %v163_v14 = vmul.f32 0.0625, %v147_v10  ;;  %v162_v15 = vmul.f32 0.0625, %v146_v11 }
  0x98   :  { %v106_v18 = vpop.xlane.xlu1 %105  ;;  %v58_v19 = vpop.xlane.xlu0 %57 }
  0x99   :  { %v1282_v22 = vsub.f32 %v1060_v0, %v163_v14  ;;  %v1285_v23 = vsub.f32 %v1070_v2, %v163_v14  ;;  %v1288_v26 = vsub.f32 %v1065_v1, %v162_v15  ;;  %v1291_v27 = vsub.f32 %v1079_v5, %v162_v15 }
  0x9a   :  { %v148_v30 = vadd.f32 %v106_v18, %v58_v19 }
  0x9b   :  { %v274_v31 = vmul.f32 %v1291_v27, %v1291_v27  ;;  %v210_v34 = vmul.f32 %v1288_v26, %v1288_v26  ;;  %v275_v2 = vmul.f32 %v1285_v23, %v1285_v23  ;;  %v211_v5 = vmul.f32 %v1282_v22, %v1282_v22 }
  0x9c   :  { %v164_v35 = vmul.f32 0.0625, %v148_v30  ;;  %v109_v38 = vpop.xlane.xlu1 %108  ;;  %v61_v0 = vpop.xlane.xlu0 %60 }
  0x9d   :  { %v290_v39 = vsel %vm49_vm0, %v274_v31, 0.0  ;;  %v226_v1 = vsel %vm49_vm0, %v210_v34, 0.0  ;;  %v149_v42 = vadd.f32 %v109_v38, %v61_v0  ;;  %v293_v50 = vsel %vm49_vm0, %v275_v2, 0.0 }
  0x9e   :  { %v1304_v43 = vsub.f32 %v1093_v9, %v164_v35  ;;  %v1307_v46 = vsub.f32 %v1088_v8, %v164_v35  ;;  %291 = vadd.xlane.f32.xlu1 %v290_v39  ;;  %227 = vadd.xlane.f32.xlu0 %v226_v1  ;;  %v229_v8 = vsel %vm49_vm0, %v211_v5, 0.0 }
  0x9f   :  { %v165_v47 = vmul.f32 0.0625, %v149_v42 }
  0xa0   :  { %v112_v51 = vpop.xlane.xlu1 %111  ;;  %v64_v54 = vpop.xlane.xlu0 %63  ;;  %v276_v55 = vmul.f32 %v1307_v46, %v1307_v46  ;;  %v212_v58 = vmul.f32 %v1304_v43, %v1304_v43 }
  0xa1   :  { %v1315_v59 = vsub.f32 %v1107_v13, %v165_v47  ;;  %v1318_v9 = vsub.f32 %v1102_v12, %v165_v47  ;;  %v150_v62 = vadd.f32 %v112_v51, %v64_v54 }
  0xa2   :  { %294 = vadd.xlane.f32.xlu1 %v293_v50  ;;  %230 = vadd.xlane.f32.xlu0 %v229_v8  ;;  %v296_v63 = vsel %vm49_vm0, %v276_v55, 0.0  ;;  %v232_v4 = vsel %vm49_vm0, %v212_v58, 0.0 }
  0xa3   :  { %v166_v3 = vmul.f32 0.0625, %v150_v62  ;;  %v277_v6 = vmul.f32 %v1318_v9, %v1318_v9  ;;  %v213_v13 = vmul.f32 %v1315_v59, %v1315_v59 }
  0xa4   :  { %v115_v7 = vpop.xlane.xlu1 %114  ;;  %v67_v10 = vpop.xlane.xlu0 %66 }
  0xa5   :  { %v1328_v12 = vsub.f32 %v1121_v17, %v166_v3  ;;  %v1331_v11 = vsub.f32 %v1116_v16, %v166_v3  ;;  %v151_v14 = vadd.f32 %v115_v7, %v67_v10  ;;  %v299_v15 = vsel %vm49_vm0, %v277_v6, 0.0 }
  0xa6   :  { %297 = vadd.xlane.f32.xlu1 %v296_v63  ;;  %233 = vadd.xlane.f32.xlu0 %v232_v4  ;;  %v235_v19 = vsel %vm49_vm0, %v213_v13, 0.0 }
  0xa7   :  { %v167_v18 = vmul.f32 0.0625, %v151_v14  ;;  %v278_v30 = vmul.f32 %v1331_v11, %v1331_v11  ;;  %v214_v31 = vmul.f32 %v1328_v12, %v1328_v12 }
  0xa8   :  { %v118_v34 = vpop.xlane.xlu1 %117  ;;  %v70_v17 = vpop.xlane.xlu0 %69 }
  0xa9   :  { %v1340_v35 = vsub.f32 %v1135_v21, %v167_v18  ;;  %v1343_v16 = vsub.f32 %v1130_v20, %v167_v18  ;;  %v152_v38 = vadd.f32 %v118_v34, %v70_v17  ;;  %v302_v0 = vsel %vm49_vm0, %v278_v30, 0.0 }
  0xaa   :  { %300 = vadd.xlane.f32.xlu1 %v299_v15  ;;  %236 = vadd.xlane.f32.xlu0 %v235_v19  ;;  %v238_v39 = vsel %vm49_vm0, %v214_v31, 0.0 }
  0xab   :  { %v168_v2 = vmul.f32 0.0625, %v152_v38  ;;  %v279_v1 = vmul.f32 %v1343_v16, %v1343_v16  ;;  %v215_v42 = vmul.f32 %v1340_v35, %v1340_v35 }
  0xac   :  { %v121_v5 = vpop.xlane.xlu1 %120  ;;  %v73_v21 = vpop.xlane.xlu0 %72 }
  0xad   :  { %v1352_v47 = vsub.f32 %v1149_v25, %v168_v2  ;;  %v1355_v20 = vsub.f32 %v1144_v24, %v168_v2  ;;  %v153_v50 = vadd.f32 %v121_v5, %v73_v21  ;;  %v305_v51 = vsel %vm49_vm0, %v279_v1, 0.0 }
  0xae   :  { %303 = vadd.xlane.f32.xlu1 %v302_v0  ;;  %239 = vadd.xlane.f32.xlu0 %v238_v39  ;;  %v241_v55 = vsel %vm49_vm0, %v215_v42, 0.0 }
  0xaf   :  { %v169_v54 = vmul.f32 0.0625, %v153_v50  ;;  %v280_v58 = vmul.f32 %v1355_v20, %v1355_v20  ;;  %v216_v8 = vmul.f32 %v1352_v47, %v1352_v47 }
  0xb0   :  { %v124_v62 = vpop.xlane.xlu1 %123  ;;  %v76_v25 = vpop.xlane.xlu0 %75 }
  0xb1   :  { %v1364_v63 = vsub.f32 %v1163_v29, %v169_v54  ;;  %v1367_v24 = vsub.f32 %v1158_v28, %v169_v54  ;;  %v154_v3 = vadd.f32 %v124_v62, %v76_v25  ;;  %v308_v4 = vsel %vm49_vm0, %v280_v58, 0.0 }
  0xb2   :  { %306 = vadd.xlane.f32.xlu1 %v305_v51  ;;  %242 = vadd.xlane.f32.xlu0 %v241_v55  ;;  %v244_v13 = vsel %vm49_vm0, %v216_v8, 0.0 }
  0xb3   :  { %v170_v6 = vmul.f32 0.0625, %v154_v3  ;;  %v281_v7 = vmul.f32 %v1367_v24, %v1367_v24  ;;  %v217_v10 = vmul.f32 %v1364_v63, %v1364_v63 }
  0xb4   :  { %v127_v14 = vpop.xlane.xlu1 %126  ;;  %v79_v29 = vpop.xlane.xlu0 %78 }
  0xb5   :  { %v1376_v15 = vsub.f32 %v1177_v33, %v170_v6  ;;  %v1379_v28 = vsub.f32 %v1172_v32, %v170_v6  ;;  %v155_v18 = vadd.f32 %v127_v14, %v79_v29  ;;  %v311_v19 = vsel %vm49_vm0, %v281_v7, 0.0  ;;  %v418_v7 = vld [vmem:[%s1630_s1] sm:$0xff] }
  0xb6   :  { %309 = vadd.xlane.f32.xlu1 %v308_v4  ;;  %245 = vadd.xlane.f32.xlu0 %v244_v13  ;;  %v247_v31 = vsel %vm49_vm0, %v217_v10, 0.0  ;;  %v435_v13 = vld [vmem:[%s1629_s2] sm:$0xff] }
  0xb7   :  { %v171_v30 = vmul.f32 0.0625, %v155_v18  ;;  %v282_v34 = vmul.f32 %v1379_v28, %v1379_v28  ;;  %v218_v17 = vmul.f32 %v1376_v15, %v1376_v15  ;;  %932 = vmatprep.subr.mxu1 %v435_v13  ;;  %958 = vmatprep.subr.mxu0 %v418_v7 }
  0xb8   :  { %v130_v38 = vpop.xlane.xlu1 %129  ;;  %v82_v33 = vpop.xlane.xlu0 %81  ;;  %933 = vmatpush3.msra.mxu1 %v435_v13  ;;  %959 = vmatpush3.msra.mxu0 %v418_v7 }
  0xb9   :  { %v1388_v0 = vsub.f32 %v1191_v37, %v171_v30  ;;  %v1391_v32 = vsub.f32 %v1186_v36, %v171_v30  ;;  %v156_v2 = vadd.f32 %v130_v38, %v82_v33  ;;  %v314_v39 = vsel %vm49_vm0, %v282_v34, 0.0 }
  0xba   :  { %312 = vadd.xlane.f32.xlu1 %v311_v19  ;;  %248 = vadd.xlane.f32.xlu0 %v247_v31  ;;  %v250_v42 = vsel %vm49_vm0, %v218_v17, 0.0 }
  0xbb   :  { %v172_v1 = vmul.f32 0.0625, %v156_v2  ;;  %v283_v5 = vmul.f32 %v1391_v32, %v1391_v32  ;;  %v219_v21 = vmul.f32 %v1388_v0, %v1388_v0 }
  0xbc   :  { %v133_v50 = vpop.xlane.xlu1 %132  ;;  %v85_v37 = vpop.xlane.xlu0 %84 }
  0xbd   :  { %v1400_v51 = vsub.f32 %v1205_v41, %v172_v1  ;;  %v1403_v36 = vsub.f32 %v1200_v40, %v172_v1  ;;  %v157_v54 = vadd.f32 %v133_v50, %v85_v37  ;;  %v317_v55 = vsel %vm49_vm0, %v283_v5, 0.0 }
  0xbe   :  { %315 = vadd.xlane.f32.xlu1 %v314_v39  ;;  %251 = vadd.xlane.f32.xlu0 %v250_v42  ;;  %v253_v8 = vsel %vm49_vm0, %v219_v21, 0.0 }
  0xbf   :  { %v173_v58 = vmul.f32 0.0625, %v157_v54  ;;  %v284_v62 = vmul.f32 %v1403_v36, %v1403_v36  ;;  %v220_v25 = vmul.f32 %v1400_v51, %v1400_v51 }
  0xc0   :  { %v136_v3 = vpop.xlane.xlu1 %135  ;;  %v88_v41 = vpop.xlane.xlu0 %87 }
  0xc1   :  { %v1412_v4 = vsub.f32 %v1219_v45, %v173_v58  ;;  %v1415_v40 = vsub.f32 %v1214_v44, %v173_v58  ;;  %v158_v6 = vadd.f32 %v136_v3, %v88_v41  ;;  %v320_v10 = vsel %vm49_vm0, %v284_v62, 0.0 }
  0xc2   :  { %318 = vadd.xlane.f32.xlu1 %v317_v55  ;;  %254 = vadd.xlane.f32.xlu0 %v253_v8  ;;  %v256_v45 = vsel %vm49_vm0, %v220_v25, 0.0 }
  0xc3   :  { %v174_v14 = vmul.f32 0.0625, %v158_v6  ;;  %v285_v44 = vmul.f32 %v1415_v40, %v1415_v40  ;;  %v221_v29 = vmul.f32 %v1412_v4, %v1412_v4 }
  0xc4   :  { %v139_v18 = vpop.xlane.xlu1 %138  ;;  %v91_v19 = vpop.xlane.xlu0 %90 }
  0xc5   :  { %v1430_v30 = vsub.f32 %v1233_v49, %v174_v14  ;;  %v1433_v31 = vsub.f32 %v1228_v48, %v174_v14  ;;  %v159_v34 = vadd.f32 %v139_v18, %v91_v19  ;;  %v323_v17 = vsel %vm49_vm0, %v285_v44, 0.0 }
  0xc6   :  { %321 = vadd.xlane.f32.xlu1 %v320_v10  ;;  %257 = vadd.xlane.f32.xlu0 %v256_v45  ;;  %v259_v33 = vsel %vm49_vm0, %v221_v29, 0.0 }
  0xc7   :  { %v175_v38 = vmul.f32 0.0625, %v159_v34  ;;  %v286_v2 = vmul.f32 %v1433_v31, %v1433_v31  ;;  %v222_v39 = vmul.f32 %v1430_v30, %v1430_v30 }
  0xc8   :  { %v142_v1 = vpop.xlane.xlu1 %141  ;;  %v94_v49 = vpop.xlane.xlu0 %93 }
  0xc9   :  { %v1442_v42 = vsub.f32 %v1247_v53, %v175_v38  ;;  %v1445_v48 = vsub.f32 %v1242_v52, %v175_v38  ;;  %v160_v5 = vadd.f32 %v142_v1, %v94_v49  ;;  %v326_v21 = vsel %vm49_vm0, %v286_v2, 0.0 }
  0xca   :  { %324 = vadd.xlane.f32.xlu1 %v323_v17  ;;  %260 = vadd.xlane.f32.xlu0 %v259_v33  ;;  %v262_v37 = vsel %vm49_vm0, %v222_v39, 0.0 }
  0xcb   :  { %v176_v50 = vmul.f32 0.0625, %v160_v5  ;;  %v287_v54 = vmul.f32 %v1445_v48, %v1445_v48  ;;  %v223_v55 = vmul.f32 %v1442_v42, %v1442_v42 }
  0xcc   :  { %v145_v58 = vpop.xlane.xlu1 %144  ;;  %v97_v53 = vpop.xlane.xlu0 %96 }
  0xcd   :  { %v1454_v8 = vsub.f32 %v1261_v57, %v176_v50  ;;  %v1457_v52 = vsub.f32 %v1256_v56, %v176_v50  ;;  %v161_v62 = vadd.f32 %v145_v58, %v97_v53  ;;  %v329_v25 = vsel %vm49_vm0, %v287_v54, 0.0 }
  0xce   :  { %327 = vadd.xlane.f32.xlu1 %v326_v21  ;;  %263 = vadd.xlane.f32.xlu0 %v262_v37  ;;  %v265_v41 = vsel %vm49_vm0, %v223_v55, 0.0 }
  0xcf   :  { %v177_v3 = vmul.f32 0.0625, %v161_v62  ;;  %v288_v6 = vmul.f32 %v1457_v52, %v1457_v52  ;;  %v224_v13 = vmul.f32 %v1454_v8, %v1454_v8 }
  0xd1   :  { %v1466_v57 = vsub.f32 %v1275_v61, %v177_v3  ;;  %v1469_v56 = vsub.f32 %v1270_v60, %v177_v3  ;;  %v332_v7 = vsel %vm49_vm0, %v288_v6, 0.0  ;;  %v268_v10 = vsel %vm49_vm0, %v224_v13, 0.0 }
  0xd2   :  { %330 = vadd.xlane.f32.xlu1 %v329_v25  ;;  %266 = vadd.xlane.f32.xlu0 %v265_v41 }
  0xd3   :  { %v289_v14 = vmul.f32 %v1469_v56, %v1469_v56  ;;  %v225_v45 = vmul.f32 %v1466_v57, %v1466_v57 }
  0xd5   :  { %v335_v61 = vsel %vm49_vm0, %v289_v14, 0.0  ;;  %v271_v44 = vsel %vm49_vm0, %v225_v45, 0.0 }
  0xd6   :  { %333 = vadd.xlane.f32.xlu1 %v332_v7  ;;  %269 = vadd.xlane.f32.xlu0 %v268_v10 }
  0xda   :  { %336 = vadd.xlane.f32.xlu1 %v335_v61  ;;  %272 = vadd.xlane.f32.xlu0 %v271_v44 }
 0x12b   :  { %v292_v60 = vpop.xlane.xlu1 %291  ;;  %v228_v29 = vpop.xlane.xlu0 %227 }
 0x12c   :  { %v338_v18 = vadd.f32 %v292_v60, %v228_v29 }
 0x12e   :  { %v354_v19 = vmul.f32 0.0625, %v338_v18 }
 0x12f   :  { %v295_v34 = vpop.xlane.xlu1 %294  ;;  %v231_v17 = vpop.xlane.xlu0 %230 }
 0x130   :  { %v370_v38 = vadd.f32 1e-05, %v354_v19  ;;  %v339_v33 = vadd.f32 %v295_v34, %v231_v17 }
 0x132   :  { %1000 = vrsqrt.f32 %v370_v38  ;;  %v355_v2 = vmul.f32 0.0625, %v339_v33 }
 0x133   :  { %v298_v39 = vpop.xlane.xlu1 %297  ;;  %v234_v1 = vpop.xlane.xlu0 %233 }
 0x134   :  { %v371_v49 = vadd.f32 1e-05, %v355_v2  ;;  %v340_v5 = vadd.f32 %v298_v39, %v234_v1 }
 0x136   :  { %1002 = vrsqrt.f32 %v371_v49  ;;  %v356_v21 = vmul.f32 0.0625, %v340_v5 }
 0x137   :  { %v301_v50 = vpop.xlane.xlu1 %300  ;;  %v237_v37 = vpop.xlane.xlu0 %236 }
 0x138   :  { %v372_v54 = vadd.f32 1e-05, %v356_v21  ;;  %v341_v55 = vadd.f32 %v301_v50, %v237_v37 }
 0x13a   :  { %1004 = vrsqrt.f32 %v372_v54  ;;  %v357_v58 = vmul.f32 0.0625, %v341_v55 }
 0x13b   :  { %v304_v53 = vpop.xlane.xlu1 %303  ;;  %v240_v62 = vpop.xlane.xlu0 %239 }
 0x13c   :  { %v1001_v25 = vpop.eup %1000  ;;  %v373_v3 = vadd.f32 1e-05, %v357_v58  ;;  %v342_v41 = vadd.f32 %v304_v53, %v240_v62 }
 0x13d   :  { %v419_v6 = vmul.f32 %v1001_v25, %v1291_v27  ;;  %v402_v13 = vmul.f32 %v1001_v25, %v1288_v26 }
 0x13e   :  { %1006 = vrsqrt.f32 %v373_v3  ;;  %v358_v7 = vmul.f32 0.0625, %v342_v41 }
 0x13f   :  { %v307_v10 = vpop.xlane.xlu1 %306  ;;  %934 = vmatprep.mubr.msk.f32.mxu1 %vm49_vm0, %v419_v6  ;;  %960 = vmatprep.mubr.msk.f32.mxu0 %vm49_vm0, %v402_v13  ;;  %v243_v14 = vpop.xlane.xlu0 %242 }
 0x140   :  { %v1003_v45 = vpop.eup %1002  ;;  %v374_v61 = vadd.f32 1e-05, %v358_v7  ;;  %v343_v44 = vadd.f32 %v307_v10, %v243_v14 }
 0x141   :  { %v420_v60 = vmul.f32 %v1003_v45, %v1285_v23  ;;  %v403_v29 = vmul.f32 %v1003_v45, %v1282_v22 }
 0x142   :  { %1008 = vrsqrt.f32 %v374_v61  ;;  %v359_v18 = vmul.f32 0.0625, %v343_v44 }
 0x143   :  { %v310_v27 = vpop.xlane.xlu1 %309  ;;  %935 = vmatmul.mubr.msk.f32.vlgmr.msra.gmra.mrb[0].mxu1 %vm49_vm0, %v420_v60  ;;  %961 = vmatmul.mubr.msk.f32.vlgmr.msra.gmra.mrb[0].mxu0 %vm49_vm0, %v403_v29  ;;  %v246_v26 = vpop.xlane.xlu0 %245 }
 0x144   :  { %v1005_v19 = vpop.eup %1004  ;;  %v375_v34 = vadd.f32 1e-05, %v359_v18  ;;  %v344_v17 = vadd.f32 %v310_v27, %v246_v26 }
 0x145   :  { %v421_v38 = vmul.f32 %v1005_v19, %v1307_v46  ;;  %v404_v33 = vmul.f32 %v1005_v19, %v1304_v43 }
 0x146   :  { %1010 = vrsqrt.f32 %v375_v34  ;;  %v360_v2 = vmul.f32 0.0625, %v344_v17 }
 0x147   :  { %v313_v23 = vpop.xlane.xlu1 %312  ;;  %937 = vmatprep.mubr.msk.f32.mxu1 %vm49_vm0, %v421_v38  ;;  %963 = vmatprep.mubr.msk.f32.mxu0 %vm49_vm0, %v404_v33  ;;  %v249_v22 = vpop.xlane.xlu0 %248 }
 0x148   :  { %v1007_v39 = vpop.eup %1006  ;;  %v376_v1 = vadd.f32 1e-05, %v360_v2  ;;  %v345_v49 = vadd.f32 %v313_v23, %v249_v22 }
 0x149   :  { %v422_v5 = vmul.f32 %v1007_v39, %v1318_v9  ;;  %v405_v21 = vmul.f32 %v1007_v39, %v1315_v59 }
 0x14a   :  { %1012 = vrsqrt.f32 %v376_v1  ;;  %v361_v50 = vmul.f32 0.0625, %v345_v49 }
 0x14b   :  { %v316_v46 = vpop.xlane.xlu1 %315  ;;  %938 = vmatmul.mubr.msk.f32.gmra.mrb[2].mxu1 %vm49_vm0, %v422_v5  ;;  %964 = vmatmul.mubr.msk.f32.gmra.mrb[2].mxu0 %vm49_vm0, %v405_v21  ;;  %v252_v43 = vpop.xlane.xlu0 %251 }
 0x14c   :  { %v1009_v37 = vpop.eup %1008  ;;  %v377_v54 = vadd.f32 1e-05, %v361_v50  ;;  %v346_v55 = vadd.f32 %v316_v46, %v252_v43 }
 0x14d   :  { %v423_v58 = vmul.f32 %v1009_v37, %v1331_v11  ;;  %v406_v53 = vmul.f32 %v1009_v37, %v1328_v12 }
 0x14e   :  { %1014 = vrsqrt.f32 %v377_v54  ;;  %v362_v62 = vmul.f32 0.0625, %v346_v55 }
 0x14f   :  { %v319_v9 = vpop.xlane.xlu1 %318  ;;  %940 = vmatprep.mubr.msk.f32.mxu1 %vm49_vm0, %v423_v58  ;;  %966 = vmatprep.mubr.msk.f32.mxu0 %vm49_vm0, %v406_v53  ;;  %v255_v59 = vpop.xlane.xlu0 %254 }
 0x150   :  { %v1011_v25 = vpop.eup %1010  ;;  %v378_v3 = vadd.f32 1e-05, %v362_v62  ;;  %v347_v41 = vadd.f32 %v319_v9, %v255_v59 }
 0x151   :  { %v424_v6 = vmul.f32 %v1011_v25, %v1343_v16  ;;  %v407_v13 = vmul.f32 %v1011_v25, %v1340_v35 }
 0x152   :  { %1016 = vrsqrt.f32 %v378_v3  ;;  %v363_v7 = vmul.f32 0.0625, %v347_v41 }
 0x153   :  { %v322_v11 = vpop.xlane.xlu1 %321  ;;  %941 = vmatmul.mubr.msk.f32.gmra.mrb[4].mxu1 %vm49_vm0, %v424_v6  ;;  %967 = vmatmul.mubr.msk.f32.gmra.mrb[4].mxu0 %vm49_vm0, %v407_v13  ;;  %v258_v12 = vpop.xlane.xlu0 %257 }
 0x154   :  { %v1013_v10 = vpop.eup %1012  ;;  %v379_v14 = vadd.f32 1e-05, %v363_v7  ;;  %v348_v45 = vadd.f32 %v322_v11, %v258_v12 }
 0x155   :  { %v425_v61 = vmul.f32 %v1013_v10, %v1355_v20  ;;  %v408_v44 = vmul.f32 %v1013_v10, %v1352_v47 }
 0x156   :  { %1018 = vrsqrt.f32 %v379_v14  ;;  %v364_v60 = vmul.f32 0.0625, %v348_v45 }
 0x157   :  { %v325_v16 = vpop.xlane.xlu1 %324  ;;  %943 = vmatprep.mubr.msk.f32.mxu1 %vm49_vm0, %v425_v61  ;;  %969 = vmatprep.mubr.msk.f32.mxu0 %vm49_vm0, %v408_v44  ;;  %v261_v35 = vpop.xlane.xlu0 %260 }
 0x158   :  { %v1015_v29 = vpop.eup %1014  ;;  %v380_v18 = vadd.f32 1e-05, %v364_v60  ;;  %v349_v27 = vadd.f32 %v325_v16, %v261_v35 }
 0x159   :  { %v426_v26 = vmul.f32 %v1015_v29, %v1367_v24  ;;  %v409_v19 = vmul.f32 %v1015_v29, %v1364_v63 }
 0x15a   :  { %1020 = vrsqrt.f32 %v380_v18  ;;  %v365_v34 = vmul.f32 0.0625, %v349_v27 }
 0x15b   :  { %v328_v20 = vpop.xlane.xlu1 %327  ;;  %944 = vmatmul.mubr.msk.f32.gmra.mrb[6].mxu1 %vm49_vm0, %v426_v26  ;;  %970 = vmatmul.mubr.msk.f32.gmra.mrb[6].mxu0 %vm49_vm0, %v409_v19  ;;  %v264_v47 = vpop.xlane.xlu0 %263 }
 0x15c   :  { %v1017_v17 = vpop.eup %1016  ;;  %v381_v38 = vadd.f32 1e-05, %v365_v34  ;;  %v350_v33 = vadd.f32 %v328_v20, %v264_v47 }
 0x15d   :  { %v427_v2 = vmul.f32 %v1017_v17, %v1379_v28  ;;  %v410_v23 = vmul.f32 %v1017_v17, %v1376_v15 }
 0x15e   :  { %1022 = vrsqrt.f32 %v381_v38  ;;  %v366_v22 = vmul.f32 0.0625, %v350_v33 }
 0x15f   :  { %v331_v24 = vpop.xlane.xlu1 %330  ;;  %946 = vmatprep.mubr.msk.f32.mxu1 %vm49_vm0, %v427_v2  ;;  %972 = vmatprep.mubr.msk.f32.mxu0 %vm49_vm0, %v410_v23  ;;  %v267_v63 = vpop.xlane.xlu0 %266 }
 0x160   :  { %v1019_v39 = vpop.eup %1018  ;;  %v382_v1 = vadd.f32 1e-05, %v366_v22  ;;  %v351_v49 = vadd.f32 %v331_v24, %v267_v63 }
 0x161   :  { %v428_v5 = vmul.f32 %v1019_v39, %v1391_v32  ;;  %v411_v21 = vmul.f32 %v1019_v39, %v1388_v0 }
 0x162   :  { %1024 = vrsqrt.f32 %v382_v1  ;;  %v367_v50 = vmul.f32 0.0625, %v351_v49 }
 0x163   :  { %v334_v28 = vpop.xlane.xlu1 %333  ;;  %947 = vmatmul.mubr.msk.f32.gmra.mrb[8].mxu1 %vm49_vm0, %v428_v5  ;;  %973 = vmatmul.mubr.msk.f32.gmra.mrb[8].mxu0 %vm49_vm0, %v411_v21  ;;  %v270_v15 = vpop.xlane.xlu0 %269 }
 0x164   :  { %v1021_v46 = vpop.eup %1020  ;;  %v383_v43 = vadd.f32 1e-05, %v367_v50  ;;  %v352_v37 = vadd.f32 %v334_v28, %v270_v15 }
 0x165   :  { %v429_v54 = vmul.f32 %v1021_v46, %v1403_v36  ;;  %v412_v55 = vmul.f32 %v1021_v46, %v1400_v51 }
 0x166   :  { %1026 = vrsqrt.f32 %v383_v43  ;;  %v368_v58 = vmul.f32 0.0625, %v352_v37 }
 0x167   :  { %v337_v32 = vpop.xlane.xlu1 %336  ;;  %949 = vmatprep.mubr.msk.f32.mxu1 %vm49_vm0, %v429_v54  ;;  %975 = vmatprep.mubr.msk.f32.mxu0 %vm49_vm0, %v412_v55  ;;  %v273_v0 = vpop.xlane.xlu0 %272 }
 0x168   :  { %v1023_v53 = vpop.eup %1022  ;;  %v384_v62 = vadd.f32 1e-05, %v368_v58  ;;  %v353_v9 = vadd.f32 %v337_v32, %v273_v0 }
 0x169   :  { %v430_v59 = vmul.f32 %v1023_v53, %v1415_v40  ;;  %v413_v25 = vmul.f32 %v1023_v53, %v1412_v4 }
 0x16a   :  { %1028 = vrsqrt.f32 %v384_v62  ;;  %v369_v3 = vmul.f32 0.0625, %v353_v9 }
 0x16b   :  { %950 = vmatmul.mubr.msk.f32.gmra.mrb[10].mxu1 %vm49_vm0, %v430_v59  ;;  %976 = vmatmul.mubr.msk.f32.gmra.mrb[10].mxu0 %vm49_vm0, %v413_v25 }
 0x16c   :  { %v1025_v51 = vpop.eup %1024  ;;  %v385_v36 = vadd.f32 1e-05, %v369_v3 }
 0x16d   :  { %v431_v41 = vmul.f32 %v1025_v51, %v1433_v31  ;;  %v414_v6 = vmul.f32 %v1025_v51, %v1430_v30 }
 0x16e   :  { %1030 = vrsqrt.f32 %v385_v36 }
 0x16f   :  { %952 = vmatprep.mubr.msk.f32.mxu1 %vm49_vm0, %v431_v41  ;;  %978 = vmatprep.mubr.msk.f32.mxu0 %vm49_vm0, %v414_v6 }
 0x170   :  { %v1027_v40 = vpop.eup %1026 }
 0x171   :  { %v432_v4 = vmul.f32 %v1027_v40, %v1445_v48  ;;  %v415_v13 = vmul.f32 %v1027_v40, %v1442_v42 }
 0x173   :  { %953 = vmatmul.mubr.msk.f32.gmra.mrb[12].mxu1 %vm49_vm0, %v432_v4  ;;  %979 = vmatmul.mubr.msk.f32.gmra.mrb[12].mxu0 %vm49_vm0, %v415_v13 }
 0x174   :  { %v1029_v7 = vpop.eup %1028 }
 0x175   :  { %v433_v11 = vmul.f32 %v1029_v7, %v1457_v52  ;;  %v416_v31 = vmul.f32 %v1029_v7, %v1454_v8  ;;  %v1546_v52 = vld [vmem:[%s1631_s3] ss:$0 sm:$0xff] }
 0x177   :  { %955 = vmatprep.mubr.msk.f32.mxu1 %vm49_vm0, %v433_v11  ;;  %981 = vmatprep.mubr.msk.f32.mxu0 %vm49_vm0, %v416_v31 }
 0x178   :  { %v1031_v30 = vpop.eup %1030 }
 0x179   :  { %v434_v12 = vmul.f32 %v1031_v30, %v1469_v56  ;;  %v417_v48 = vmul.f32 %v1031_v30, %v1466_v57 }
 0x17b   :  { %956 = vmatmul.mubr.msk.f32.gmra.mrb[14].mxu1 %vm49_vm0, %v434_v12  ;;  %982 = vmatmul.mubr.msk.f32.gmra.mrb[14].mxu0 %vm49_vm0, %v417_v48 }
 0x216   :  { %v936_v42 = vpop.f32.mrb[0].mxu1  ;;  %v962_v10 = vpop.f32.mrb[0].mxu0 }
 0x217   :  { %v749_v8 = vadd.f32 %v962_v10, %v936_v42  ;;  %v550_v14 = vpop.f32.mrb[1].mxu1  ;;  %v743_v45 = vpop.f32.mrb[1].mxu0 }
 0x218   :  { %v744_v61 = vadd.f32 %v743_v45, %v550_v14 }
 0x219   :  { %v830_v44 = vadd.f32 %v1546_v52, %v749_v8 }
 0x21a   :  { %v829_v56 = vadd.f32 %v1546_v52, %v744_v61 }
 0x21b   :  { %846 = vst.msk [vmem:[%s1632_s4 + $0x8] sm:$0xff] %vm49_vm0, %v830_v44 }
 0x21c   :  { %845 = vst.msk [vmem:[%s1632_s4] sm:$0xff] %vm49_vm0, %v829_v56 }
 0x21e   :  { %v939_v57 = vpop.f32.mrb[2].mxu1  ;;  %v965_v60 = vpop.f32.mrb[2].mxu0 }
 0x21f   :  { %v759_v16 = vadd.f32 %v965_v60, %v939_v57  ;;  %v560_v35 = vpop.f32.mrb[3].mxu1  ;;  %v753_v29 = vpop.f32.mrb[3].mxu0 }
 0x220   :  { %v754_v18 = vadd.f32 %v753_v29, %v560_v35 }
 0x221   :  { %v832_v27 = vadd.f32 %v1546_v52, %v759_v16 }
 0x222   :  { %v831_v26 = vadd.f32 %v1546_v52, %v754_v18 }
 0x223   :  { %848 = vst.msk [vmem:[%s1632_s4 + $0x18] sm:$0xff] %vm49_vm0, %v832_v27 }
 0x224   :  { %847 = vst.msk [vmem:[%s1632_s4 + $0x10] sm:$0xff] %vm49_vm0, %v831_v26 }
 0x226   :  { %v942_v19 = vpop.f32.mrb[4].mxu1  ;;  %v968_v34 = vpop.f32.mrb[4].mxu0 }
 0x227   :  { %v769_v20 = vadd.f32 %v968_v34, %v942_v19  ;;  %v570_v47 = vpop.f32.mrb[5].mxu1  ;;  %v763_v17 = vpop.f32.mrb[5].mxu0 }
 0x228   :  { %v764_v38 = vadd.f32 %v763_v17, %v570_v47 }
 0x229   :  { %v834_v33 = vadd.f32 %v1546_v52, %v769_v20 }
 0x22a   :  { %v833_v2 = vadd.f32 %v1546_v52, %v764_v38 }
 0x22b   :  { %850 = vst.msk [vmem:[%s1632_s4 + $0x28] sm:$0xff] %vm49_vm0, %v834_v33 }
 0x22c   :  { %849 = vst.msk [vmem:[%s1632_s4 + $0x20] sm:$0xff] %vm49_vm0, %v833_v2 }
 0x22e   :  { %v945_v23 = vpop.f32.mrb[6].mxu1  ;;  %v971_v22 = vpop.f32.mrb[6].mxu0 }
 0x22f   :  { %v779_v24 = vadd.f32 %v971_v22, %v945_v23  ;;  %v580_v63 = vpop.f32.mrb[7].mxu1  ;;  %v773_v39 = vpop.f32.mrb[7].mxu0 }
 0x230   :  { %v774_v1 = vadd.f32 %v773_v39, %v580_v63 }
 0x231   :  { %v836_v49 = vadd.f32 %v1546_v52, %v779_v24 }
 0x232   :  { %v835_v5 = vadd.f32 %v1546_v52, %v774_v1 }
 0x233   :  { %852 = vst.msk [vmem:[%s1632_s4 + $0x38] sm:$0xff] %vm49_vm0, %v836_v49 }
 0x234   :  { %851 = vst.msk [vmem:[%s1632_s4 + $0x30] sm:$0xff] %vm49_vm0, %v835_v5 }
 0x236   :  { %v948_v21 = vpop.f32.mrb[8].mxu1  ;;  %v974_v50 = vpop.f32.mrb[8].mxu0 }
 0x237   :  { %v789_v28 = vadd.f32 %v974_v50, %v948_v21  ;;  %v590_v15 = vpop.f32.mrb[9].mxu1  ;;  %v783_v46 = vpop.f32.mrb[9].mxu0 }
 0x238   :  { %v784_v43 = vadd.f32 %v783_v46, %v590_v15 }
 0x239   :  { %v838_v37 = vadd.f32 %v1546_v52, %v789_v28 }
 0x23a   :  { %v837_v54 = vadd.f32 %v1546_v52, %v784_v43 }
 0x23b   :  { %854 = vst.msk [vmem:[%s1632_s4 + $0x48] sm:$0xff] %vm49_vm0, %v838_v37 }
 0x23c   :  { %853 = vst.msk [vmem:[%s1632_s4 + $0x40] sm:$0xff] %vm49_vm0, %v837_v54 }
 0x23e   :  { %v951_v55 = vpop.f32.mrb[10].mxu1  ;;  %v977_v58 = vpop.f32.mrb[10].mxu0 }
 0x23f   :  { %v799_v32 = vadd.f32 %v977_v58, %v951_v55  ;;  %v600_v0 = vpop.f32.mrb[11].mxu1  ;;  %v793_v53 = vpop.f32.mrb[11].mxu0 }
 0x240   :  { %v794_v62 = vadd.f32 %v793_v53, %v600_v0 }
 0x241   :  { %v840_v9 = vadd.f32 %v1546_v52, %v799_v32 }
 0x242   :  { %v839_v59 = vadd.f32 %v1546_v52, %v794_v62 }
 0x243   :  { %856 = vst.msk [vmem:[%s1632_s4 + $0x58] sm:$0xff] %vm49_vm0, %v840_v9 }
 0x244   :  { %855 = vst.msk [vmem:[%s1632_s4 + $0x50] sm:$0xff] %vm49_vm0, %v839_v59 }
 0x246   :  { %v954_v25 = vpop.f32.mrb[12].mxu1  ;;  %v980_v3 = vpop.f32.mrb[12].mxu0 }
 0x247   :  { %v809_v51 = vadd.f32 %v980_v3, %v954_v25  ;;  %v610_v36 = vpop.f32.mrb[13].mxu1  ;;  %v803_v41 = vpop.f32.mrb[13].mxu0 }
 0x248   :  { %v804_v6 = vadd.f32 %v803_v41, %v610_v36 }
 0x249   :  { %v842_v40 = vadd.f32 %v1546_v52, %v809_v51 }
 0x24a   :  { %v841_v4 = vadd.f32 %v1546_v52, %v804_v6 }
 0x24b   :  { %858 = vst.msk [vmem:[%s1632_s4 + $0x68] sm:$0xff] %vm49_vm0, %v842_v40 }
 0x24c   :  { %857 = vst.msk [vmem:[%s1632_s4 + $0x60] sm:$0xff] %vm49_vm0, %v841_v4 }
 0x24e   :  { %v957_v13 = vpop.f32.mrb[14].mxu1  ;;  %v983_v7 = vpop.f32.mrb[14].mxu0 }
 0x24f   :  { %v819_v11 = vadd.f32 %v983_v7, %v957_v13  ;;  %v620_v31 = vpop.f32.mrb[15].mxu1  ;;  %v813_v30 = vpop.f32.mrb[15].mxu0 }
 0x250   :  { %v814_v12 = vadd.f32 %v813_v30, %v620_v31 }
 0x251   :  { %v844_v48 = vadd.f32 %v1546_v52, %v819_v11 }
 0x252   :  { %v843_v42 = vadd.f32 %v1546_v52, %v814_v12 }
 0x253   :  { %860 = vst.msk [vmem:[%s1632_s4 + $0x78] sm:$0xff] %vm49_vm0, %v844_v48 }
 0x254   :  { %859 = vst.msk [vmem:[%s1632_s4 + $0x70] sm:$0xff] %vm49_vm0, %v843_v42 }

</bundles_post_ra>
